<compile_context>
chip_gen: v6e
topology: v6e:2x2x1
jax: 0.10.0
libtpu: 0.0.40
codegen_flags: <defaults>
</compile_context>

<pallas_src>
import jax
import jax.numpy as jnp
from jax.experimental import pallas as pl
from jax.experimental.pallas import tpu as pltpu

LANE = 128
MAX_TILE_BYTES = 4 * 1024 * 1024      # 4 MiB per block (per perf review)
VMEM_LIMIT_BYTES = 32 * 1024 * 1024   # 2 bufs x (in + out) x 4 MiB = 16 MiB, 2x headroom


def _sublane_for(dtype):
    # Sub-32-bit dtypes pack along sublanes: native row granule is 8 * (4 / itemsize).
    itemsize = jnp.dtype(dtype).itemsize
    return max(8, 32 // itemsize)


def _round_up(x, m):
    return ((x + m - 1) // m) * m


def _make_trap_kernel(a, inv_ba, d, inv_dc, e):
    # Constants are concrete Python floats -> baked into the kernel (no SMEM operand).
    def kernel(x_ref, o_ref):
        # f32 compute keeps the kernel correct on v5e (no bf16 VALU); the kernel is
        # HBM-bandwidth bound so the upcast is free on v6e/v7x too.
        x = x_ref[...].astype(jnp.float32)
        rise = (x - a) * inv_ba          # FMA, replaces divide
        fall = (d - x) * inv_dc          # FMA, replaces divide
        y = jnp.minimum(jnp.minimum(rise, fall), jnp.float32(1.0))
        y = jnp.maximum(y, jnp.float32(0.0))
        o_ref[...] = (e * y).astype(o_ref.dtype)

    return kernel


def _trap_xla(x, a, inv_ba, d, inv_dc, e):
    # Fused XLA elementwise fallback: exactly 1 HBM read + 1 HBM write.
    xf = x.astype(jnp.float32)
    y = jnp.minimum(jnp.minimum((xf - a) * inv_ba, (d - xf) * inv_dc), 1.0)
    y = jnp.maximum(y, 0.0)
    return (e * y).astype(x.dtype)


def trapezoidal_mf(x, a=-1.0, b=-0.5, c=0.5, d=1.0, e=1.0):
    """Pallas TPU implementation of TrapezoidalMF.forward (elementwise)."""
    # __init__ sorts the four breakpoints.
    a, b, c, d = sorted((float(a), float(b), float(c), float(d)))
    e = float(e)
    # TODO(synk): degenerate breakpoints (b==a or d==c) divide by zero in the
    # reference (inf/nan); the epsilon guard makes this a step function instead.
    tiny = 1e-12
    inv_ba = 1.0 / max(b - a, tiny)
    inv_dc = 1.0 / max(d - c, tiny)

    orig_shape = x.shape
    n = x.size
    if n == 0:
        return x

    sublane = _sublane_for(x.dtype)

    # Ragged (lane-misaligned) or tiny inputs: plain fused XLA is already at the
    # HBM roofline with no per-step overhead -- no pad + slice round trip.
    if (n % LANE != 0) or (n // LANE < sublane):
        return _trap_xla(x, a, inv_ba, d, inv_dc, e)

    rows = n // LANE
    xf = x.reshape(rows, LANE)  # lane-dense slab; free reshape, no HBM copy

    itemsize = jnp.dtype(x.dtype).itemsize
    max_tile_rows = MAX_TILE_BYTES // (LANE * itemsize)
    # Aim for >= ~4 grid steps so read/compute/writeback pipeline, clamp to the
    # VMEM budget, never go below one native sublane granule.
    desired = _round_up(pl.cdiv(rows, 4), sublane)
    tile_rows = max(sublane, min(max_tile_rows, desired, _round_up(rows, sublane)))
    grid = (pl.cdiv(rows, tile_rows),)   # partial trailing block is masked by Pallas

    kernel = _make_trap_kernel(a, inv_ba, d, inv_dc, e)
    cost = pl.CostEstimate(
        flops=6 * n,
        transcendentals=0,
        bytes_accessed=2 * n * itemsize,
    )

    out = pl.pallas_call(
        kernel,
        out_shape=jax.ShapeDtypeStruct((rows, LANE), x.dtype),
        grid=grid,
        in_specs=[pl.BlockSpec((tile_rows, LANE), lambda i: (i, 0))],
        out_specs=pl.BlockSpec((tile_rows, LANE), lambda i: (i, 0)),
        compiler_params=pltpu.CompilerParams(
            # "parallel" lets multi-TC chips (v7x) shard the streaming axis.
            dimension_semantics=("parallel",),
            vmem_limit_bytes=VMEM_LIMIT_BYTES,
        ),
        cost_estimate=cost,
    )(xf)

    return out.reshape(orig_shape)


def _trap_reference(x, a, b, c, d, e):
    a, b, c, d = sorted((float(a), float(b), float(c), float(d)))
    xf = x.astype(jnp.float32)
    rise = (xf - a) / (b - a)
    fall = (d - xf) / (d - c)
    return (float(e) * jnp.clip(jnp.minimum(rise, fall), 0.0, 1.0)).astype(x.dtype)


if __name__ == "__main__":
    a, b, c, d, e = -1.0, -0.5, 0.5, 1.0, 1.0
    k1, k2, k3, k4 = jax.random.split(jax.random.PRNGKey(0), 4)

    # Case 1: NCHW input, lane/sublane aligned -> zero-copy Pallas path.
    x1 = jax.random.normal(k1, (2, 4, 16, 16), dtype=jnp.float32) * 1.5
    y1 = jax.block_until_ready(trapezoidal_mf(x1, a, b, c, d, e))
    r1 = _trap_reference(x1, a, b, c, d, e)
    assert y1.shape == x1.shape and y1.dtype == x1.dtype
    assert jnp.allclose(y1, r1, atol=1e-6, rtol=1e-5)

    # Case 2: rows not divisible by tile_rows -> masked partial trailing block.
    x2 = jax.random.normal(k2, (100, 128), dtype=jnp.float32) * 1.5
    y2 = jax.block_until_ready(trapezoidal_mf(x2, a, b, c, d, e))
    r2 = _trap_reference(x2, a, b, c, d, e)
    assert jnp.allclose(y2, r2, atol=1e-6, rtol=1e-5)

    # Case 3: bf16 input -> dtype-aware sublane tiling, f32 compute inside.
    x3 = (jax.random.normal(k3, (4, 32, 128), dtype=jnp.float32) * 1.5).astype(jnp.bfloat16)
    y3 = jax.block_until_ready(trapezoidal_mf(x3, a, b, c, d, e))
    r3 = _trap_reference(x3, a, b, c, d, e)
    assert y3.shape == x3.shape and y3.dtype == jnp.bfloat16
    assert jnp.allclose(y3.astype(jnp.float32), r3.astype(jnp.float32), atol=2e-2, rtol=2e-2)

    # Case 4: ragged element count -> fused XLA fallback (no pad+slice round trip).
    x4 = jax.random.normal(k4, (3, 5, 7, 11), dtype=jnp.float32) * 1.5
    y4 = jax.block_until_ready(trapezoidal_mf(x4, a, b, c, d, e))
    r4 = _trap_reference(x4, a, b, c, d, e)
    assert y4.shape == x4.shape and y4.dtype == x4.dtype
    assert jnp.allclose(y4, r4, atol=1e-6, rtol=1e-5)

    print("KERNEL_OK")
</pallas_src>

<mosaic_0001>
module attributes {stable_mosaic.version = 11 : i64} {
  func.func @kernel(%arg0: i32, %arg1: memref<8x128xf32, #tpu.memory_space<vmem>>, %arg2: memref<8x128xf32, #tpu.memory_space<vmem>>) attributes {dimension_semantics = [#tpu.dimension_semantics<parallel>], iteration_bounds = array<i64: 2>, scalar_prefetch = 0 : i64, scratch_operands = 0 : i64, tpu.core_type = #tpu.core_type<tc>, window_params = [{transform_indices = @transform_0, window_bounds = array<i64: 8, 128>}, {transform_indices = @transform_1, window_bounds = array<i64: 8, 128>}]} {
    %c0 = arith.constant 0 : index
    %c0_0 = arith.constant 0 : index
    %0 = vector.load %arg1[%c0, %c0_0] : memref<8x128xf32, #tpu.memory_space<vmem>>, vector<8x128xf32>
    %cst = arith.constant -1.000000e+00 : f32
    %1 = vector.broadcast %cst : f32 to vector<8x128xf32>
    %2 = arith.subf %0, %1 : vector<8x128xf32>
    %cst_1 = arith.constant 2.000000e+00 : f32
    %3 = vector.broadcast %cst_1 : f32 to vector<8x128xf32>
    %4 = arith.mulf %2, %3 : vector<8x128xf32>
    %cst_2 = arith.constant 1.000000e+00 : f32
    %5 = vector.broadcast %cst_2 : f32 to vector<8x128xf32>
    %6 = arith.subf %5, %0 : vector<8x128xf32>
    %cst_3 = arith.constant 2.000000e+00 : f32
    %7 = vector.broadcast %cst_3 : f32 to vector<8x128xf32>
    %8 = arith.mulf %6, %7 : vector<8x128xf32>
    %9 = arith.minimumf %4, %8 : vector<8x128xf32>
    %cst_4 = arith.constant 1.000000e+00 : f32
    %10 = vector.broadcast %cst_4 : f32 to vector<8x128xf32>
    %11 = arith.minimumf %9, %10 : vector<8x128xf32>
    %cst_5 = arith.constant 0.000000e+00 : f32
    %12 = vector.broadcast %cst_5 : f32 to vector<8x128xf32>
    %13 = arith.maximumf %11, %12 : vector<8x128xf32>
    %cst_6 = arith.constant 1.000000e+00 : f32
    %14 = vector.broadcast %cst_6 : f32 to vector<8x128xf32>
    %15 = arith.mulf %14, %13 : vector<8x128xf32>
    %c0_7 = arith.constant 0 : index
    %c0_8 = arith.constant 0 : index
    %16 = vector.load %arg2[%c0_7, %c0_8] : memref<8x128xf32, #tpu.memory_space<vmem>>, vector<8x128xf32>
    tpu.vector_store %arg2[%c0_7, %c0_8], %15 {strides = array<i32>} : memref<8x128xf32, #tpu.memory_space<vmem>>, vector<8x128xf32>,
    return
  }
  func.func @transform_0(%arg0: i32) -> (i32, i32) {
    %c0_i32 = arith.constant 0 : i32
    %c0_i32_0 = arith.constant 0 : i32
    return %arg0, %c0_i32 : i32, i32
  }
  func.func @transform_1(%arg0: i32) -> (i32, i32) {
    %c0_i32 = arith.constant 0 : i32
    %c0_i32_0 = arith.constant 0 : i32
    return %arg0, %c0_i32 : i32, i32
  }
}

</mosaic_0001>

<bundles_post_ra>
// kernel: tpu_custom_call.1
= control target key start
LH: loop header
LB: loop body
LE: loop exit
PB: predicated region body
PF: predicated region fallthrough
CT: control target
= control target key end

     0   :  { %6 = vsyncpa [#allocation3], 0  ;;  %s531_s0 = inlined_call_operand.hbm [shape: f32[16,128], index: 0, kind: input, shape index: {}]   ;;  %s532_s1 = inlined_call_operand.hbm [shape: f32[16,128], index: 1, kind: output, shape index: {}]  }
   0x1   :  { %8 = vsyncpa [#allocation3 + $0x1], 0 }
   0x2   :  { %9 = vsyncpa [#allocation4], 0 }
   0x3   :  { %11 = vsyncpa [#allocation4 + $0x1], 0  ;;  %s390_s6 = smov 0   ;;  %s392_s7 = smov 0  }
   0x4   :  { %s394_s8 = smov 0   ;;  %s396_s9 = smov 0  }
   0x5 LB: > { %s411_s10 = sadd.s32 4294967295, %s376_s9   ;;  %s225_s11 = sadd.s32 4294967294, %s376_s9   ;;  %s376_s9 = sphi %s396_s9, %s549_s9   ;;  %s372_s8 = sphi %s394_s8, %s548_s8   ;;  %s368_s7 = sphi %s392_s7, %s547_s7   ;;  %s364_s6 = sphi %s390_s6, %s546_s6  }
   0x6   : > { %s415_s12 = sadd.s32 1, %s376_s9   ;;  %s24_s13 = sadd.s32 1, %s372_s8 }
   0x7   : > { %s21_s14 = ssub.s32 %s376_s9, %s415_s12  ;;  %p31_p0 = scmp.ne.s32.totalorder %s372_s8, %s368_s7 }
   0x8   : > { %p22_p1 = scmp.eq.s32.totalorder %s21_s14, 0  ;;  %p32_p2 = scmp.eq.s32.totalorder %s376_s9, 0 }
   0x9   : > { %p37_p3 = scmp.ne.s32.totalorder %s368_s7, %s364_s6  ;;  %p38_p4 = scmp.eq.s32.totalorder %s411_s10, 0 }
   0xa   : > { %s427_s15 = scalar_select %p22_p1, %s372_s8, %s24_s13  }
   0xb   : > { %p429_p5 = por %p32_p2, %p31_p0  ;;  %p433_p6 = por %p38_p4, %p37_p3 }
   0xc   : > { %p61_p7 = scmp.eq.s32.totalorder %s411_s10, 1  ;;  %p67_p8 = scmp.eq.s32.totalorder %s225_s11, 1 }
   0xd   : > { %s536_s17 = scalar_select %p433_p6, 1, 0 }
   0xe   : > { %p250_p10 = scmp.lt.s32.totalorder %s376_s9, 2  ;;  %p440_p11 = por %p61_p7, %p31_p0 }
   0xf   : > { %p444_p12 = por %p67_p8, %p37_p3  ;;  %s87_s20 = sand.u32 1, %s372_s8  }
  0x10   : > { %s537_s18 = scalar_select %p440_p11, 1, 0 }
  0x11   : > { %s538_s19 = scalar_select %p444_p12, 1, 0 }
  0x12   : > { %s229_s21 = sshll.u32 %s376_s9, 7  ;;  %s228_s22 = sshll.u32 %s87_s20, 3 }
  0x13   : > { %s453_s25 = scalar_lea.hbm %s531_s0, %s229_s21  ;;  %s91_s26 = scalar_lea.vmem [#allocation2], %s228_s22 }
  0x14   : > { %s98_s27 = sshll.u32 %s91_s26, 4  ;;  %p457_p13 = pnand %p250_p10, %p429_p5  ;;  %s461_s27 = int_to_ptr.vmem [resolvable:$true] %s98_s27 }
  0x15   : > { %s88_s29 = scalar_lea.sflag [#allocation3], %s87_s20  ;;  %s284_s30 = scalar_lea.hbm %s453_s25, 128 }
  0x16   : > { %p285_p2 = scmp.ne.s32.totalorder %s453_s25, %s284_s30  ;;  %p286_p3 = pneg %p457_p13 }
  0x17   : > { %s289_s4 = scalar_lea.hbm %s531_s0, 256  ;;  %p290_p5 = scmp.lt.s32.totalorder %s453_s25, %s531_s0 }
  0x18   : > { %p287_p4 = pnand %p286_p3, %p285_p2  ;;  %p291_p8 = scmp.lt.s32.totalorder %s289_s4, %s284_s30 }
  0x1a   : > { %p288_p7 = pneg %p287_p4  ;;  %p292_p10 = por %p291_p8, %p290_p5 }
  0x1c   : > { %p293_p9 = pnand %p292_p10, %p288_p7 }
  0x1e   : > { %296 = shalt.err (!%p293_p9)
}
  0x1f   : > { %s297_s13 = scalar_lea.vmem %s461_s27, 128  ;;  %s378_s14 = smov [#allocation2]  }
  0x20   : > { %p298_p0 = scmp.ne.s32.totalorder %s461_s27, %s297_s13  ;;  %s302_s16 = sshll.u32 %s378_s14, 4  ;;  %s303_s16 = int_to_ptr.vmem [resolvable:$false] %s302_s16 }
  0x21   : > { %s304_s20 = scalar_lea.vmem %s303_s16, 256  ;;  %p305_p4 = scmp.lt.s32.totalorder %s461_s27, %s303_s16 }
  0x22   : > { %p300_p1 = pnand %p298_p0, %p286_p3  ;;  %p306_p12 = scmp.lt.s32.totalorder %s304_s20, %s297_s13 }
  0x24   : > { %p301_p2 = pneg %p300_p1  ;;  %p307_p11 = por %p306_p12, %p305_p4 }
  0x26   : > { %p308_p6 = pnand %p307_p11, %p301_p2 }
  0x28   : > { %311 = shalt.err (!%p308_p6)
}
  0x29   : > { %245 = dma.hbm_to_vmem [thread:$0]  (!%p457_p13), %s453_s25, 128, %s461_s27, %s88_s29  }
  0x2a   : > { %p540_p9 = scmp.lt.s32.totalorder %s376_s9, 3  ;;  %p541_p7 = scmp.ge.s32.totalorder %s376_s9, 1 }
  0x2c   : > { %p104_p0 = pnand %p541_p7, %p540_p9 }
  0x2d   : > { %s488_s21 = sand.u32 (!%p104_p0), 1, %s368_s7   ;;  %p542_p6 = scmp.ne.s32.totalorder (!%p104_p0), %s536_s17, 0 }
  0x2e   : > { %107 = sbr.rel (%p104_p0) target bundleno = 77 (0x4d), region = 24  ;;  %s231_s22 = sshll.u32 (!%p104_p0), %s488_s21, 3 }
  0x2f   : > { %s110_s23 = scalar_lea.sflag (!%p104_p0), [#allocation3], %s488_s21  ;;  %s113_s24 = scalar_lea.vmem (!%p104_p0), [#allocation2], %s231_s22 }
  0x33   : > { %355 = dma.done.wait (%p542_p6), %s110_s23, 128  }
  0x34   : > { %357 = vsyncadd (%p542_p6), %s110_s23, 4294967168  ;;  %v132_v0 = vld [vmem:[%s113_s24] sm:$0xff]  ;;  %s131_s25 = scalar_lea.vmem [#allocation5], %s231_s22  ;;  %s235_s27 = sshll.u32 %s411_s10, 7 }
  0x35   : > { %v233_v1 = vadd.f32 1.0, %v132_v0  ;;  %v135_v2 = vsub.f32 1.0, %v132_v0  ;;  %s155_s26 = sshll.u32 %s131_s25, 4  ;;  %s153_s17 = scalar_lea.hbm %s532_s1, %s235_s27  ;;  %s156_s26 = int_to_ptr.vmem [resolvable:$true] %s155_s26 }
  0x36   : > { %s142_s30 = scalar_lea.sflag [#allocation4], %s488_s21  ;;  %s312_s2 = scalar_lea.vmem %s156_s26, 128 }
  0x37   : > { %v134_v3 = vmul.f32 2.0, %v233_v1  ;;  %v136_v4 = vmul.f32 2.0, %v135_v2  ;;  %p313_p11 = scmp.ne.s32.totalorder %s156_s26, %s312_s2  ;;  %p543_p12 = scmp.ne.s32.totalorder %s537_s18, 0 }
  0x38   : > { %s379_s3 = smov [#allocation5]  }
  0x39   : > { %v137_v5 = vmin.f32 %v134_v3, %v136_v4  ;;  %p314_p13 = pnand %p313_p11, %p543_p12  ;;  %s316_s4 = sshll.u32 %s379_s3, 4  ;;  %s317_s4 = int_to_ptr.vmem [resolvable:$false] %s316_s4 }
  0x3a   : > { %s318_s5 = scalar_lea.vmem %s317_s4, 256  ;;  %p319_p3 = scmp.lt.s32.totalorder %s156_s26, %s317_s4 }
  0x3b   : > { %v138_v6 = vmin.f32 %v137_v5, 1.0  ;;  %p315_p1 = pneg %p314_p13  ;;  %p320_p5 = scmp.lt.s32.totalorder %s318_s5, %s312_s2 }
  0x3d   : > { %v139_v7 = vmax.f32 %v138_v6, 0.0  ;;  %p321_p8 = por %p320_p5, %p319_p3 }
  0x3f   : > { %140 = vst [vmem:[%s131_s25] sm:$0xff] %v139_v7  ;;  %p322_p10 = pnand %p321_p8, %p315_p1 }
  0x41   : > { %325 = shalt.err (!%p322_p10)
}
  0x42   : > { %s326_s10 = scalar_lea.hbm %s153_s17, 128  ;;  %s330_s14 = scalar_lea.hbm %s532_s1, 256 }
  0x43   : > { %p327_p2 = scmp.ne.s32.totalorder %s153_s17, %s326_s10  ;;  %p331_p7 = scmp.lt.s32.totalorder %s153_s17, %s532_s1 }
  0x44   : > { %p332_p0 = scmp.lt.s32.totalorder %s330_s14, %s326_s10 }
  0x45   : > { %p328_p4 = pnand %p327_p2, %p543_p12 }
  0x46   : > { %p333_p6 = por %p332_p0, %p331_p7 }
  0x47   : > { %p329_p9 = pneg %p328_p4 }
  0x49   : > { %p334_p11 = pnand %p333_p6, %p329_p9 }
  0x4b   : > { %337 = shalt.err (!%p334_p11)
}
  0x4c   : > { %240 = dma.vmem_to_hbm [thread:$0]  (%p543_p12), %s156_s26, 128, %s153_s17, %s142_s30  }
  0x4d PF: > { %s167_s21 = sand.u32 1, %s364_s6   ;;  %p544_p13 = scmp.ne.s32.totalorder %s538_s19, 0 }
  0x4e   : > { %p545_p1 = scmp.ge.s32.totalorder %s376_s9, 2  ;;  %s168_s22 = scalar_lea.sflag [#allocation4], %s167_s21 }
  0x50   : > { %p247_p3 = pnand %p545_p1, %p544_p13 }
  0x52   : > { %p248_p5 = pneg %p247_p3 }
  0x54   : > { %359 = dma.done.wait (%p248_p5), %s168_s22, 128  }
  0x55   : > { %361 = vsyncadd (%p248_p5), %s168_s22, 4294967168  ;;  %p14_p8 = scmp.ge.s32.totalorder %s415_s12, 4   ;;  %s546_s6 = smov %s368_s7 }
  0x56   : > { %s547_s7 = smov %s372_s8  ;;  %s548_s8 = smov %s427_s15 }
  0x57   : > { %s549_s9 = smov %s415_s12  ;;  %16 = sbr.rel (!%p14_p8) target bundleno = 5 (0x5), region = 69 }
  0x5c   :  { %173 = vsyncpa [#allocation3], 1 }
  0x5d   :  { %175 = vsyncpa [#allocation3 + $0x1], 1 }
  0x5e   :  { %176 = vsyncpa [#allocation4], 1 }
  0x5f   :  { %178 = vsyncpa [#allocation4 + $0x1], 1 }

</bundles_post_ra>
